<compile_context>
chip_gen: v6e
topology: v6e:2x2x1
jax: 0.10.0
libtpu: 0.0.40
codegen_flags: <defaults>
</compile_context>

<pallas_src>
import jax
import jax.numpy as jnp
from jax.experimental import pallas as pl
from jax.experimental.pallas import tpu as pltpu


_LANES = 512          # lane-dense last dim (multiple of 128)
_TILE_M_MAX = 1024    # 1024 x 512 x 4B = 2 MiB per f32 tile


def _round_up(x, k):
    return (x + k - 1) // k * k


def _fusion_kernel(w_ref, x0_ref, x1_ref, o_ref):
    # w_ref : (1,) scalar weight in SMEM (f32)
    # x0_ref, x1_ref, o_ref : (TILE_M, LANES) VMEM tiles
    w = w_ref[0]
    o_ref[...] = ((x0_ref[...] + x1_ref[...]) * w).astype(o_ref.dtype)


def convex_learned_fusion(x0, x1, weights):
    """out = weights * (x0 + x1); weights has shape (1, 1, 1, 1)."""
    assert x0.shape == x1.shape and x0.dtype == x1.dtype
    orig_shape = x0.shape
    out_dtype = x0.dtype

    n = x0.size
    lanes = _LANES

    # Rows needed, rounded up to a legal tile height (multiple of 8 sublanes).
    m_min = pl.cdiv(n, lanes)
    tile_m = min(_TILE_M_MAX, _round_up(m_min, 8))
    m_pad = _round_up(m_min, tile_m)
    n_pad = m_pad * lanes

    x0_flat = x0.reshape(-1)
    x1_flat = x1.reshape(-1)
    if n_pad != n:
        pad = n_pad - n
        x0_flat = jnp.pad(x0_flat, (0, pad))
        x1_flat = jnp.pad(x1_flat, (0, pad))

    x0_2d = x0_flat.reshape(m_pad, lanes)
    x1_2d = x1_flat.reshape(m_pad, lanes)
    w_smem = weights.reshape(1).astype(jnp.float32)

    grid = (m_pad // tile_m,)

    # 3 tensors (x0, x1, out) x 2 pipeline buffers x one tile, plus headroom.
    tile_bytes = tile_m * lanes * jnp.dtype(out_dtype).itemsize
    vmem_limit = 3 * 2 * tile_bytes + (8 << 20)

    out_2d = pl.pallas_call(
        _fusion_kernel,
        out_shape=jax.ShapeDtypeStruct((m_pad, lanes), out_dtype),
        grid=grid,
        in_specs=[
            pl.BlockSpec(memory_space=pltpu.SMEM),               # scalar weight
            pl.BlockSpec((tile_m, lanes), lambda i: (i, 0)),      # x0 tile
            pl.BlockSpec((tile_m, lanes), lambda i: (i, 0)),      # x1 tile
        ],
        out_specs=pl.BlockSpec((tile_m, lanes), lambda i: (i, 0)),
        compiler_params=pltpu.CompilerParams(
            dimension_semantics=("parallel",),
            vmem_limit_bytes=int(vmem_limit),
        ),
    )(w_smem, x0_2d, x1_2d)

    return out_2d.reshape(-1)[:n].reshape(orig_shape)


if __name__ == "__main__":
    key = jax.random.PRNGKey(0)
    k0, k1 = jax.random.split(key)

    B, C, H, W = 2, 4, 16, 16
    x0 = jax.random.normal(k0, (B, C, H, W), dtype=jnp.float32)
    x1 = jax.random.normal(k1, (B, C, H, W), dtype=jnp.float32)

    # Parameter init mirrors the module: ones((1, 1, 1, 1)).
    weights = jnp.ones((1, 1, 1, 1), dtype=jnp.float32)

    out = convex_learned_fusion(x0, x1, weights)
    out = jax.block_until_ready(out)

    # Reference check against plain JAX (same math as the PyTorch forward).
    ref = jnp.sum(jnp.stack([x0, x1], axis=1) * weights, axis=1)
    assert out.shape == (B, C, H, W)
    assert out.dtype == x0.dtype
    assert jnp.allclose(out, ref, atol=1e-6, rtol=1e-6)

    # Also exercise a non-128-divisible / multi-tile-ish shape to confirm the
    # padding + grid path is correct.
    x0b = jax.random.normal(k0, (2, 3, 17, 19), dtype=jnp.float32)
    x1b = jax.random.normal(k1, (2, 3, 17, 19), dtype=jnp.float32)
    outb = jax.block_until_ready(convex_learned_fusion(x0b, x1b, weights))
    refb = jnp.sum(jnp.stack([x0b, x1b], axis=1) * weights, axis=1)
    assert jnp.allclose(outb, refb, atol=1e-6, rtol=1e-6)

    print("KERNEL_OK")
</pallas_src>

<mosaic_0001>
module attributes {stable_mosaic.version = 11 : i64} {
  func.func @_fusion_kernel(%arg0: i32, %arg1: memref<1xf32, #tpu.memory_space<smem>>, %arg2: memref<8x512xf32, #tpu.memory_space<vmem>>, %arg3: memref<8x512xf32, #tpu.memory_space<vmem>>, %arg4: memref<8x512xf32, #tpu.memory_space<vmem>>) attributes {dimension_semantics = [#tpu.dimension_semantics<parallel>], iteration_bounds = array<i64: 1>, scalar_prefetch = 0 : i64, scratch_operands = 0 : i64, tpu.core_type = #tpu.core_type<tc>, window_params = [{transform_indices = @transform_0, window_bounds = array<i64: 1>}, {transform_indices = @transform_1, window_bounds = array<i64: 8, 512>}, {transform_indices = @transform_2, window_bounds = array<i64: 8, 512>}, {transform_indices = @transform_3, window_bounds = array<i64: 8, 512>}]} {
    %c0 = arith.constant 0 : index
    %0 = memref.load %arg1[%c0] : memref<1xf32, #tpu.memory_space<smem>>
    %c0_0 = arith.constant 0 : index
    %c0_1 = arith.constant 0 : index
    %1 = vector.load %arg2[%c0_0, %c0_1] : memref<8x512xf32, #tpu.memory_space<vmem>>, vector<8x512xf32>
    %c0_2 = arith.constant 0 : index
    %c0_3 = arith.constant 0 : index
    %2 = vector.load %arg3[%c0_2, %c0_3] : memref<8x512xf32, #tpu.memory_space<vmem>>, vector<8x512xf32>
    %3 = arith.addf %1, %2 : vector<8x512xf32>
    %4 = vector.broadcast %0 : f32 to vector<8x512xf32>
    %5 = arith.mulf %3, %4 : vector<8x512xf32>
    %c0_4 = arith.constant 0 : index
    %c0_5 = arith.constant 0 : index
    %6 = vector.load %arg4[%c0_4, %c0_5] : memref<8x512xf32, #tpu.memory_space<vmem>>, vector<8x512xf32>
    tpu.vector_store %arg4[%c0_4, %c0_5], %5 {strides = array<i32>} : memref<8x512xf32, #tpu.memory_space<vmem>>, vector<8x512xf32>,
    return
  }
  func.func @transform_0(%arg0: i32) -> i32 {
    %c0_i32 = arith.constant 0 : i32
    %c0_i32_0 = arith.constant 0 : i32
    return %c0_i32 : i32
  }
  func.func @transform_1(%arg0: i32) -> (i32, i32) {
    %c0_i32 = arith.constant 0 : i32
    %c0_i32_0 = arith.constant 0 : i32
    return %arg0, %c0_i32 : i32, i32
  }
  func.func @transform_2(%arg0: i32) -> (i32, i32) {
    %c0_i32 = arith.constant 0 : i32
    %c0_i32_0 = arith.constant 0 : i32
    return %arg0, %c0_i32 : i32, i32
  }
  func.func @transform_3(%arg0: i32) -> (i32, i32) {
    %c0_i32 = arith.constant 0 : i32
    %c0_i32_0 = arith.constant 0 : i32
    return %arg0, %c0_i32 : i32, i32
  }
}

</mosaic_0001>

<bundles_post_ra>
// kernel: tpu_custom_call.1
= control target key start
LH: loop header
LB: loop body
LE: loop exit
PB: predicated region body
PF: predicated region fallthrough
CT: control target
= control target key end

     0   :  { %9 = vsyncpa [#allocation4], 0  ;;  %s182_s0 = inlined_call_operand.<no memory space> [shape: f32[1], index: 0, kind: input, shape index: {}]   ;;  %s183_s1 = inlined_call_operand.hbm [shape: f32[8,512], index: 1, kind: input, shape index: {}]   ;;  %s184_s2 = inlined_call_operand.hbm [shape: f32[8,512], index: 2, kind: input, shape index: {}]   ;;  %s185_s3 = inlined_call_operand.hbm [shape: f32[8,512], index: 3, kind: output, shape index: {}]  }
   0x1   :  { %10 = vsyncpa [#allocation7], 0 }
   0x2   :  { %11 = vsyncpa [#allocation5], 0  ;;  %s147_s12 = smov [#allocation3]   ;;  %s148_s14 = smov [#allocation6]  }
   0x3   :  { %s20_s13 = sshll.u32 %s147_s12, 4  ;;  %s30_s15 = sshll.u32 %s148_s14, 4  ;;  %s21_s13 = int_to_ptr.vmem [resolvable:$true] %s20_s13  ;;  %s31_s15 = int_to_ptr.vmem [resolvable:$true] %s30_s15 }
   0x4   :  { %s89_s16 = scalar_lea.vmem %s21_s13, 512  ;;  %p94_p1 = scmp.lt.s32.totalorder %s21_s13, %s21_s13 }
   0x5   :  { %p90_p0 = scmp.ne.s32.totalorder %s21_s13, %s89_s16  ;;  %p95_p2 = scmp.lt.s32.totalorder %s89_s16, %s89_s16 }
   0x7   :  { %p96_p3 = por %p95_p2, %p94_p1 }
   0x9   :  { %p97_p4 = pnand %p96_p3, %p90_p0 }
   0xb   :  { %100 = shalt.err (!%p97_p4)
}
   0xc   :  { %23 = dma.hbm_to_vmem [thread:$0]  %s183_s1, 512, %s21_s13, [#allocation4]  }
   0xd   :  { %s109_s19 = scalar_lea.vmem %s31_s15, 512  ;;  %p114_p6 = scmp.lt.s32.totalorder %s31_s15, %s31_s15 }
   0xe   :  { %p110_p5 = scmp.ne.s32.totalorder %s31_s15, %s109_s19  ;;  %p115_p7 = scmp.lt.s32.totalorder %s109_s19, %s109_s19 }
  0x10   :  { %p116_p8 = por %p115_p7, %p114_p6 }
  0x12   :  { %p117_p9 = pnand %p116_p8, %p110_p5 }
  0x14   :  { %120 = shalt.err (!%p117_p9)
}
  0x15   :  { %33 = dma.hbm_to_vmem [thread:$0]  %s184_s2, 512, %s31_s15, [#allocation7]  }
  0x16   :  { %141 = dma.done.wait [#allocation4], 512  }
  0x17   :  { %142 = vsyncadd [#allocation4], 4294966784 }
  0x18   :  { %143 = dma.done.wait [#allocation7], 512  }
  0x19   :  { %144 = vsyncadd [#allocation7], 4294966784  ;;  %v41_v0 = vld [vmem:[#allocation3] sm:$0xff]  ;;  %v53_v2 = vstv %s182_s0  ;;  %v42_v3 = vld [vmem:[#allocation3 + $0x8] sm:$0xff]  ;;  %s149_s1 = smov [#allocation8]  }
  0x1a   :  { %v45_v1 = vld [vmem:[#allocation6] sm:$0xff]  ;;  %v46_v5 = vld [vmem:[#allocation6 + $0x8] sm:$0xff]  ;;  %v43_v6 = vld [vmem:[#allocation3 + $0x10] sm:$0xff]  ;;  %s68_s2 = sshll.u32 %s149_s1, 4  ;;  %s69_s2 = int_to_ptr.vmem [resolvable:$true] %s68_s2 }
  0x1b   :  { %v49_v4 = vadd.f32 %v45_v1, %v41_v0  ;;  %v47_v7 = vld [vmem:[#allocation6 + $0x10] sm:$0xff]  ;;  %v50_v8 = vadd.f32 %v46_v5, %v42_v3  ;;  %v44_v10 = vld [vmem:[#allocation3 + $0x18] sm:$0xff]  ;;  %s121_s0 = scalar_lea.vmem %s69_s2, 512  ;;  %p126_p11 = scmp.lt.s32.totalorder %s69_s2, %s69_s2 }
  0x1c   :  { %v51_v9 = vadd.f32 %v47_v7, %v43_v6  ;;  %v48_v11 = vld [vmem:[#allocation6 + $0x18] sm:$0xff]  ;;  %p122_p10 = scmp.ne.s32.totalorder %s69_s2, %s121_s0  ;;  %p127_p12 = scmp.lt.s32.totalorder %s121_s0, %s121_s0 }
  0x1d   :  { %v54_v12 = vmul.f32 %v53_v2, %v49_v4  ;;  %v52_v13 = vadd.f32 %v48_v11, %v44_v10  ;;  %v55_v14 = vmul.f32 %v53_v2, %v50_v8 }
  0x1e   :  { %v56_v15 = vmul.f32 %v53_v2, %v51_v9  ;;  %p128_p13 = por %p127_p12, %p126_p11 }
  0x1f   :  { %58 = vst [vmem:[#allocation8] sm:$0xff] %v54_v12  ;;  %v57_v16 = vmul.f32 %v53_v2, %v52_v13  ;;  %59 = vst [vmem:[#allocation8 + $0x8] sm:$0xff] %v55_v14 }
  0x20   :  { %60 = vst [vmem:[#allocation8 + $0x10] sm:$0xff] %v56_v15  ;;  %p129_p0 = pnand %p128_p13, %p122_p10 }
  0x21   :  { %61 = vst [vmem:[#allocation8 + $0x18] sm:$0xff] %v57_v16 }
  0x22   :  { %132 = shalt.err (!%p129_p0)
}
  0x23   :  { %71 = dma.vmem_to_hbm [thread:$0]  %s69_s2, 512, %s185_s3, [#allocation5]  }
  0x24   :  { %145 = dma.done.wait [#allocation5], 512  }
  0x25   :  { %146 = vsyncadd [#allocation5], 4294966784 }
  0x26   :  { %75 = vsyncpa [#allocation4], 1 }
  0x27   :  { %76 = vsyncpa [#allocation7], 1 }
  0x28   :  { %77 = vsyncpa [#allocation5], 1 }

</bundles_post_ra>
